<compile_context>
chip_gen: v7x
topology: tpu7x:2x2x1
jax: 0.10.0
libtpu: 0.0.40
codegen_flags: <defaults>
</compile_context>

<pallas_src>
import functools

import jax
import jax.numpy as jnp
from jax import lax
from jax.experimental import pallas as pl
from jax.experimental.pallas import tpu as pltpu


def _self_attention_kernel(xq_ref, xkv_ref, wq_ref, wk_ref, wv_ref, wu_ref,
                           bu_ref, o_ref, oslab_ref, *, heads, e):
    """One (batch, q-tile) per grid step.

    xq_ref  : (tq, e)        bf16  query-tile rows of x
    xkv_ref : (t,  e)        bf16  full-sequence rows of x (for K/V)
    wq/wk/wv: (e, heads*e)   bf16  projection weights (pre-transposed)
    wu_ref  : (heads*e, e)   bf16  unifyheads weight (pre-transposed)
    bu_ref  : (1, e)         f32   unifyheads bias
    o_ref   : (tq, e)        out dtype
    oslab_ref: (tq, heads*e) bf16  VMEM scratch: per-head outputs, lane dense
    """
    f32 = jnp.float32
    bf16 = jnp.bfloat16
    # Fold the q,k e^-0.25 scales into a single e^-0.5 scale on q.
    scale = e ** -0.5

    xq = xq_ref[...]     # (tq, e) bf16
    xkv = xkv_ref[...]   # (t,  e) bf16

    # bf16 MXU matmuls, f32 accumulation.
    q = (jnp.dot(xq, wq_ref[...], preferred_element_type=f32) * scale).astype(bf16)
    k = jnp.dot(xkv, wk_ref[...], preferred_element_type=f32).astype(bf16)   # (t, h*e)
    v = jnp.dot(xkv, wv_ref[...], preferred_element_type=f32).astype(bf16)   # (t, h*e)

    # Per-head attention (heads is static). Each head's result escapes to the
    # VMEM slab, so per-head intermediates do not stay live across heads.
    for hh in range(heads):
        lo = hh * e
        q_h = q[:, lo:lo + e]                      # (tq, e)
        k_h = k[:, lo:lo + e]                      # (t,  e)
        v_h = v[:, lo:lo + e]                      # (t,  e)

        # q @ k^T by contracting the last dims (no explicit transpose).
        s = lax.dot_general(q_h, k_h, (((1,), (1,)), ((), ())),
                            preferred_element_type=f32)        # (tq, t)

        # Numerically stable softmax; keep it unnormalized and defer the
        # normalization to the (tq, e)-sized result.
        m = jnp.max(s, axis=-1, keepdims=True)
        p = jnp.exp(s - m)
        l = jnp.sum(p, axis=-1, keepdims=True)

        out_h = jnp.dot(p.astype(bf16), v_h, preferred_element_type=f32)  # (tq, e)
        out_h = out_h * pl.reciprocal(l, approx=True)

        oslab_ref[:, lo:lo + e] = out_h.astype(bf16)

    # Single large unifyheads matmul: K = heads*e.
    acc = jnp.dot(oslab_ref[...], wu_ref[...], preferred_element_type=f32)  # (tq, e)
    o_ref[...] = (acc + bu_ref[...]).astype(o_ref.dtype)


def self_attention(x, wq, wk, wv, wu, bu, *, heads, q_tile=128):
    """x: (b, t, e); wq/wk/wv: (e, heads*e); wu: (heads*e, e); bu: (1, e)."""
    b, t, e = x.shape
    he = heads * e
    assert wq.shape == (e, he) and wk.shape == (e, he) and wv.shape == (e, he)
    assert wu.shape == (he, e) and bu.shape == (1, e)

    tq = t if t <= q_tile else q_tile
    assert t % tq == 0, "sequence length must be divisible by the q tile"
    nq = t // tq

    out_dtype = x.dtype

    # bf16 MXU path (f32 accumulation inside the kernel); bias stays f32.
    xb = x.astype(jnp.bfloat16)
    wqb = wq.astype(jnp.bfloat16)
    wkb = wk.astype(jnp.bfloat16)
    wvb = wv.astype(jnp.bfloat16)
    wub = wu.astype(jnp.bfloat16)
    bu32 = bu.astype(jnp.float32)

    kernel = functools.partial(_self_attention_kernel, heads=heads, e=e)

    return pl.pallas_call(
        kernel,
        out_shape=jax.ShapeDtypeStruct((b, t, e), out_dtype),
        grid_spec=pltpu.PrefetchScalarGridSpec(
            num_scalar_prefetch=0,
            grid=(b, nq),
            in_specs=[
                # q-tile rows of x
                pl.BlockSpec((pl.Squeezed(), tq, e), lambda bi, qi: (bi, qi, 0)),
                # full-sequence x for K/V (index map constant in qi -> fetched
                # once per batch element)
                pl.BlockSpec((pl.Squeezed(), t, e), lambda bi, qi: (bi, 0, 0)),
                pl.BlockSpec((e, he), lambda bi, qi: (0, 0)),   # wq
                pl.BlockSpec((e, he), lambda bi, qi: (0, 0)),   # wk
                pl.BlockSpec((e, he), lambda bi, qi: (0, 0)),   # wv
                pl.BlockSpec((he, e), lambda bi, qi: (0, 0)),   # wu
                pl.BlockSpec((1, e), lambda bi, qi: (0, 0)),    # bu
            ],
            out_specs=pl.BlockSpec((pl.Squeezed(), tq, e),
                                   lambda bi, qi: (bi, qi, 0)),
            scratch_shapes=[pltpu.VMEM((tq, he), jnp.bfloat16)],  # head-output slab
        ),
        compiler_params=pltpu.CompilerParams(
            dimension_semantics=("parallel", "parallel")),
    )(xb, xb, wqb, wkb, wvb, wub, bu32)


def self_attention_reference(x, wq, wk, wv, wu, bu, *, heads):
    """Pure-JAX (f32) mirror of the PyTorch forward, for verification."""
    b, t, e = x.shape
    scale = e ** (-0.25)
    q = (x @ wq).reshape(b, t, heads, e).transpose(0, 2, 1, 3) * scale
    k = (x @ wk).reshape(b, t, heads, e).transpose(0, 2, 1, 3) * scale
    v = (x @ wv).reshape(b, t, heads, e).transpose(0, 2, 1, 3)
    dot = jnp.einsum('bhqe,bhke->bhqk', q, k)
    attn = jax.nn.softmax(dot, axis=-1)
    out = jnp.einsum('bhqk,bhke->bhqe', attn, v)
    out = out.transpose(0, 2, 1, 3).reshape(b, t, heads * e)
    return out @ wu + bu


if __name__ == "__main__":
    # Small shapes consistent with the module: batch=2, seq=8, emb=32, heads=8.
    B, T, E, HEADS = 2, 8, 32, 8
    key = jax.random.PRNGKey(0)
    kx, kq, kk, kv, ku, kb = jax.random.split(key, 6)

    std = 1.0 / (E ** 0.5)
    x = jax.random.normal(kx, (B, T, E), dtype=jnp.float32)
    # PyTorch nn.Linear stores weight as (out, in); pre-transpose to (in, out).
    wq = (jax.random.normal(kq, (E * HEADS, E), dtype=jnp.float32) * std).T  # (E, H*E)
    wk = (jax.random.normal(kk, (E * HEADS, E), dtype=jnp.float32) * std).T
    wv = (jax.random.normal(kv, (E * HEADS, E), dtype=jnp.float32) * std).T
    wu = (jax.random.normal(ku, (E, E * HEADS), dtype=jnp.float32) * std).T  # (H*E, E)
    bu = (jax.random.normal(kb, (1, E), dtype=jnp.float32) * std)

    # Quantize inputs to bf16 once so kernel and reference see identical data
    # (the kernel runs a bf16 MXU path with f32 accumulation).
    q16 = lambda a: a.astype(jnp.bfloat16).astype(jnp.float32)
    x_q, wq_q, wk_q, wv_q, wu_q = map(q16, (x, wq, wk, wv, wu))

    out = self_attention(x_q, wq_q, wk_q, wv_q, wu_q, bu, heads=HEADS)
    out = jax.block_until_ready(out)

    ref = self_attention_reference(x_q, wq_q, wk_q, wv_q, wu_q, bu, heads=HEADS)
    assert out.shape == (B, T, E), out.shape
    assert jnp.allclose(out, ref, rtol=5e-2, atol=5e-2), (
        float(jnp.max(jnp.abs(out - ref))))

    print("KERNEL_OK")
</pallas_src>

<mosaic_0001>
module attributes {stable_mosaic.version = 11 : i64} {
  func.func @_self_attention_kernel(%arg0: i32, %arg1: i32, %arg2: memref<1x8x32xbf16, #tpu.memory_space<vmem>>, %arg3: memref<1x8x32xbf16, #tpu.memory_space<vmem>>, %arg4: memref<32x256xbf16, #tpu.memory_space<vmem>>, %arg5: memref<32x256xbf16, #tpu.memory_space<vmem>>, %arg6: memref<32x256xbf16, #tpu.memory_space<vmem>>, %arg7: memref<256x32xbf16, #tpu.memory_space<vmem>>, %arg8: memref<1x32xf32, #tpu.memory_space<vmem>>, %arg9: memref<1x8x32xf32, #tpu.memory_space<vmem>>, %arg10: memref<8x256xbf16, #tpu.memory_space<vmem>>) attributes {dimension_semantics = [#tpu.dimension_semantics<parallel>, #tpu.dimension_semantics<parallel>], iteration_bounds = array<i64: 2, 1>, scalar_prefetch = 0 : i64, scratch_operands = 1 : i64, tpu.core_type = #tpu.core_type<tc>, window_params = [{transform_indices = @transform_0, window_bounds = array<i64: 1, 8, 32>}, {transform_indices = @transform_1, window_bounds = array<i64: 1, 8, 32>}, {pipeline_mode = #tpu.pipeline_mode<synchronous>, transform_indices = @transform_2, window_bounds = array<i64: 32, 256>}, {pipeline_mode = #tpu.pipeline_mode<synchronous>, transform_indices = @transform_3, window_bounds = array<i64: 32, 256>}, {pipeline_mode = #tpu.pipeline_mode<synchronous>, transform_indices = @transform_4, window_bounds = array<i64: 32, 256>}, {pipeline_mode = #tpu.pipeline_mode<synchronous>, transform_indices = @transform_5, window_bounds = array<i64: 256, 32>}, {pipeline_mode = #tpu.pipeline_mode<synchronous>, transform_indices = @transform_6, window_bounds = array<i64: 1, 32>}, {transform_indices = @transform_7, window_bounds = array<i64: 1, 8, 32>}]} {
    %c0 = arith.constant 0 : index
    %c0_0 = arith.constant 0 : index
    %c0_1 = arith.constant 0 : index
    %0 = vector.load %arg2[%c0, %c0_0, %c0_1] : memref<1x8x32xbf16, #tpu.memory_space<vmem>>, vector<1x8x32xbf16>
    %1 = vector.shape_cast %0 : vector<1x8x32xbf16> to vector<8x32xbf16>
    %c0_2 = arith.constant 0 : index
    %c0_3 = arith.constant 0 : index
    %c0_4 = arith.constant 0 : index
    %2 = vector.load %arg3[%c0_2, %c0_3, %c0_4] : memref<1x8x32xbf16, #tpu.memory_space<vmem>>, vector<1x8x32xbf16>
    %3 = vector.shape_cast %2 : vector<1x8x32xbf16> to vector<8x32xbf16>
    %c0_5 = arith.constant 0 : index
    %c0_6 = arith.constant 0 : index
    %4 = vector.load %arg4[%c0_5, %c0_6] : memref<32x256xbf16, #tpu.memory_space<vmem>>, vector<32x256xbf16>
    %cst = arith.constant dense<0.000000e+00> : vector<8x256xf32>
    %5 = tpu.matmul %1, %4, %cst {dimension_numbers = #tpu.dot_dimension_numbers<[1], [0], [0], [1], [0, 0, 1, 1], [], []>} : vector<8x32xbf16>, vector<32x256xbf16>, vector<8x256xf32> -> vector<8x256xf32>
    %cst_7 = arith.constant 0.176776692 : f32
    %6 = vector.broadcast %cst_7 : f32 to vector<8x256xf32>
    %7 = arith.mulf %5, %6 : vector<8x256xf32>
    %8 = arith.truncf %7 : vector<8x256xf32> to vector<8x256xbf16>
    %c0_8 = arith.constant 0 : index
    %c0_9 = arith.constant 0 : index
    %9 = vector.load %arg5[%c0_8, %c0_9] : memref<32x256xbf16, #tpu.memory_space<vmem>>, vector<32x256xbf16>
    %cst_10 = arith.constant dense<0.000000e+00> : vector<8x256xf32>
    %10 = tpu.matmul %3, %9, %cst_10 {dimension_numbers = #tpu.dot_dimension_numbers<[1], [0], [0], [1], [0, 0, 1, 1], [], []>} : vector<8x32xbf16>, vector<32x256xbf16>, vector<8x256xf32> -> vector<8x256xf32>
    %11 = arith.truncf %10 : vector<8x256xf32> to vector<8x256xbf16>
    %c0_11 = arith.constant 0 : index
    %c0_12 = arith.constant 0 : index
    %12 = vector.load %arg6[%c0_11, %c0_12] : memref<32x256xbf16, #tpu.memory_space<vmem>>, vector<32x256xbf16>
    %cst_13 = arith.constant dense<0.000000e+00> : vector<8x256xf32>
    %13 = tpu.matmul %3, %12, %cst_13 {dimension_numbers = #tpu.dot_dimension_numbers<[1], [0], [0], [1], [0, 0, 1, 1], [], []>} : vector<8x32xbf16>, vector<32x256xbf16>, vector<8x256xf32> -> vector<8x256xf32>
    %14 = arith.truncf %13 : vector<8x256xf32> to vector<8x256xbf16>
    %15 = vector.extract_strided_slice %8 {offsets = [0, 0], sizes = [8, 32], strides = [1, 1]} : vector<8x256xbf16> to vector<8x32xbf16>
    %16 = vector.extract_strided_slice %11 {offsets = [0, 0], sizes = [8, 32], strides = [1, 1]} : vector<8x256xbf16> to vector<8x32xbf16>
    %17 = vector.extract_strided_slice %14 {offsets = [0, 0], sizes = [8, 32], strides = [1, 1]} : vector<8x256xbf16> to vector<8x32xbf16>
    %cst_14 = arith.constant dense<0.000000e+00> : vector<8x8xf32>
    %18 = tpu.matmul %15, %16, %cst_14 {dimension_numbers = #tpu.dot_dimension_numbers<[1], [1], [0], [0], [0, 0, 1, 0], [], []>} : vector<8x32xbf16>, vector<8x32xbf16>, vector<8x8xf32> -> vector<8x8xf32>
    %cst_15 = arith.constant dense<0xFF800000> : vector<8xf32>
    %19 = vector.multi_reduction <maximumf>, %18, %cst_15 [1] : vector<8x8xf32> to vector<8xf32>
    %20 = vector.shape_cast %19 : vector<8xf32> to vector<8x1xf32>
    %21 = vector.broadcast %20 : vector<8x1xf32> to vector<8x8xf32>
    %22 = arith.subf %18, %21 : vector<8x8xf32>
    %23 = math.exp %22 : vector<8x8xf32>
    %cst_16 = arith.constant dense<0.000000e+00> : vector<8xf32>
    %24 = vector.multi_reduction <add>, %23, %cst_16 [1] : vector<8x8xf32> to vector<8xf32>
    %25 = vector.shape_cast %24 : vector<8xf32> to vector<8x1xf32>
    %26 = arith.truncf %23 : vector<8x8xf32> to vector<8x8xbf16>
    %cst_17 = arith.constant dense<0.000000e+00> : vector<8x32xf32>
    %27 = tpu.matmul %26, %17, %cst_17 {dimension_numbers = #tpu.dot_dimension_numbers<[1], [0], [0], [1], [0, 0, 1, 1], [], []>} : vector<8x8xbf16>, vector<8x32xbf16>, vector<8x32xf32> -> vector<8x32xf32>
    %28 = tpu.reciprocal %25 {approx = true} : vector<8x1xf32> -> vector<8x1xf32>
    %29 = vector.broadcast %28 : vector<8x1xf32> to vector<8x32xf32>
    %30 = arith.mulf %27, %29 : vector<8x32xf32>
    %31 = arith.truncf %30 : vector<8x32xf32> to vector<8x32xbf16>
    %c0_18 = arith.constant 0 : index
    %c0_19 = arith.constant 0 : index
    %32 = vector.load %arg10[%c0_18, %c0_19] : memref<8x256xbf16, #tpu.memory_space<vmem>>, vector<8x32xbf16>
    tpu.vector_store %arg10[%c0_18, %c0_19], %31 {strides = array<i32>} : memref<8x256xbf16, #tpu.memory_space<vmem>>, vector<8x32xbf16>,
    %33 = vector.extract_strided_slice %8 {offsets = [0, 32], sizes = [8, 32], strides = [1, 1]} : vector<8x256xbf16> to vector<8x32xbf16>
    %34 = vector.extract_strided_slice %11 {offsets = [0, 32], sizes = [8, 32], strides = [1, 1]} : vector<8x256xbf16> to vector<8x32xbf16>
    %35 = vector.extract_strided_slice %14 {offsets = [0, 32], sizes = [8, 32], strides = [1, 1]} : vector<8x256xbf16> to vector<8x32xbf16>
    %cst_20 = arith.constant dense<0.000000e+00> : vector<8x8xf32>
    %36 = tpu.matmul %33, %34, %cst_20 {dimension_numbers = #tpu.dot_dimension_numbers<[1], [1], [0], [0], [0, 0, 1, 0], [], []>} : vector<8x32xbf16>, vector<8x32xbf16>, vector<8x8xf32> -> vector<8x8xf32>
    %cst_21 = arith.constant dense<0xFF800000> : vector<8xf32>
    %37 = vector.multi_reduction <maximumf>, %36, %cst_21 [1] : vector<8x8xf32> to vector<8xf32>
    %38 = vector.shape_cast %37 : vector<8xf32> to vector<8x1xf32>
    %39 = vector.broadcast %38 : vector<8x1xf32> to vector<8x8xf32>
    %40 = arith.subf %36, %39 : vector<8x8xf32>
    %41 = math.exp %40 : vector<8x8xf32>
    %cst_22 = arith.constant dense<0.000000e+00> : vector<8xf32>
    %42 = vector.multi_reduction <add>, %41, %cst_22 [1] : vector<8x8xf32> to vector<8xf32>
    %43 = vector.shape_cast %42 : vector<8xf32> to vector<8x1xf32>
    %44 = arith.truncf %41 : vector<8x8xf32> to vector<8x8xbf16>
    %cst_23 = arith.constant dense<0.000000e+00> : vector<8x32xf32>
    %45 = tpu.matmul %44, %35, %cst_23 {dimension_numbers = #tpu.dot_dimension_numbers<[1], [0], [0], [1], [0, 0, 1, 1], [], []>} : vector<8x8xbf16>, vector<8x32xbf16>, vector<8x32xf32> -> vector<8x32xf32>
    %46 = tpu.reciprocal %43 {approx = true} : vector<8x1xf32> -> vector<8x1xf32>
    %47 = vector.broadcast %46 : vector<8x1xf32> to vector<8x32xf32>
    %48 = arith.mulf %45, %47 : vector<8x32xf32>
    %49 = arith.truncf %48 : vector<8x32xf32> to vector<8x32xbf16>
    %c0_24 = arith.constant 0 : index
    %c32 = arith.constant 32 : index
    %50 = vector.load %arg10[%c0_24, %c32] : memref<8x256xbf16, #tpu.memory_space<vmem>>, vector<8x32xbf16>
    tpu.vector_store %arg10[%c0_24, %c32], %49 {strides = array<i32>} : memref<8x256xbf16, #tpu.memory_space<vmem>>, vector<8x32xbf16>,
    %51 = vector.extract_strided_slice %8 {offsets = [0, 64], sizes = [8, 32], strides = [1, 1]} : vector<8x256xbf16> to vector<8x32xbf16>
    %52 = vector.extract_strided_slice %11 {offsets = [0, 64], sizes = [8, 32], strides = [1, 1]} : vector<8x256xbf16> to vector<8x32xbf16>
    %53 = vector.extract_strided_slice %14 {offsets = [0, 64], sizes = [8, 32], strides = [1, 1]} : vector<8x256xbf16> to vector<8x32xbf16>
    %cst_25 = arith.constant dense<0.000000e+00> : vector<8x8xf32>
    %54 = tpu.matmul %51, %52, %cst_25 {dimension_numbers = #tpu.dot_dimension_numbers<[1], [1], [0], [0], [0, 0, 1, 0], [], []>} : vector<8x32xbf16>, vector<8x32xbf16>, vector<8x8xf32> -> vector<8x8xf32>
    %cst_26 = arith.constant dense<0xFF800000> : vector<8xf32>
    %55 = vector.multi_reduction <maximumf>, %54, %cst_26 [1] : vector<8x8xf32> to vector<8xf32>
    %56 = vector.shape_cast %55 : vector<8xf32> to vector<8x1xf32>
    %57 = vector.broadcast %56 : vector<8x1xf32> to vector<8x8xf32>
    %58 = arith.subf %54, %57 : vector<8x8xf32>
    %59 = math.exp %58 : vector<8x8xf32>
    %cst_27 = arith.constant dense<0.000000e+00> : vector<8xf32>
    %60 = vector.multi_reduction <add>, %59, %cst_27 [1] : vector<8x8xf32> to vector<8xf32>
    %61 = vector.shape_cast %60 : vector<8xf32> to vector<8x1xf32>
    %62 = arith.truncf %59 : vector<8x8xf32> to vector<8x8xbf16>
    %cst_28 = arith.constant dense<0.000000e+00> : vector<8x32xf32>
    %63 = tpu.matmul %62, %53, %cst_28 {dimension_numbers = #tpu.dot_dimension_numbers<[1], [0], [0], [1], [0, 0, 1, 1], [], []>} : vector<8x8xbf16>, vector<8x32xbf16>, vector<8x32xf32> -> vector<8x32xf32>
    %64 = tpu.reciprocal %61 {approx = true} : vector<8x1xf32> -> vector<8x1xf32>
    %65 = vector.broadcast %64 : vector<8x1xf32> to vector<8x32xf32>
    %66 = arith.mulf %63, %65 : vector<8x32xf32>
    %67 = arith.truncf %66 : vector<8x32xf32> to vector<8x32xbf16>
    %c0_29 = arith.constant 0 : index
    %c64 = arith.constant 64 : index
    %68 = vector.load %arg10[%c0_29, %c64] : memref<8x256xbf16, #tpu.memory_space<vmem>>, vector<8x32xbf16>
    tpu.vector_store %arg10[%c0_29, %c64], %67 {strides = array<i32>} : memref<8x256xbf16, #tpu.memory_space<vmem>>, vector<8x32xbf16>,
    %69 = vector.extract_strided_slice %8 {offsets = [0, 96], sizes = [8, 32], strides = [1, 1]} : vector<8x256xbf16> to vector<8x32xbf16>
    %70 = vector.extract_strided_slice %11 {offsets = [0, 96], sizes = [8, 32], strides = [1, 1]} : vector<8x256xbf16> to vector<8x32xbf16>
    %71 = vector.extract_strided_slice %14 {offsets = [0, 96], sizes = [8, 32], strides = [1, 1]} : vector<8x256xbf16> to vector<8x32xbf16>
    %cst_30 = arith.constant dense<0.000000e+00> : vector<8x8xf32>
    %72 = tpu.matmul %69, %70, %cst_30 {dimension_numbers = #tpu.dot_dimension_numbers<[1], [1], [0], [0], [0, 0, 1, 0], [], []>} : vector<8x32xbf16>, vector<8x32xbf16>, vector<8x8xf32> -> vector<8x8xf32>
    %cst_31 = arith.constant dense<0xFF800000> : vector<8xf32>
    %73 = vector.multi_reduction <maximumf>, %72, %cst_31 [1] : vector<8x8xf32> to vector<8xf32>
    %74 = vector.shape_cast %73 : vector<8xf32> to vector<8x1xf32>
    %75 = vector.broadcast %74 : vector<8x1xf32> to vector<8x8xf32>
    %76 = arith.subf %72, %75 : vector<8x8xf32>
    %77 = math.exp %76 : vector<8x8xf32>
    %cst_32 = arith.constant dense<0.000000e+00> : vector<8xf32>
    %78 = vector.multi_reduction <add>, %77, %cst_32 [1] : vector<8x8xf32> to vector<8xf32>
    %79 = vector.shape_cast %78 : vector<8xf32> to vector<8x1xf32>
    %80 = arith.truncf %77 : vector<8x8xf32> to vector<8x8xbf16>
    %cst_33 = arith.constant dense<0.000000e+00> : vector<8x32xf32>
    %81 = tpu.matmul %80, %71, %cst_33 {dimension_numbers = #tpu.dot_dimension_numbers<[1], [0], [0], [1], [0, 0, 1, 1], [], []>} : vector<8x8xbf16>, vector<8x32xbf16>, vector<8x32xf32> -> vector<8x32xf32>
    %82 = tpu.reciprocal %79 {approx = true} : vector<8x1xf32> -> vector<8x1xf32>
    %83 = vector.broadcast %82 : vector<8x1xf32> to vector<8x32xf32>
    %84 = arith.mulf %81, %83 : vector<8x32xf32>
    %85 = arith.truncf %84 : vector<8x32xf32> to vector<8x32xbf16>
    %c0_34 = arith.constant 0 : index
    %c96 = arith.constant 96 : index
    %86 = vector.load %arg10[%c0_34, %c96] : memref<8x256xbf16, #tpu.memory_space<vmem>>, vector<8x32xbf16>
    tpu.vector_store %arg10[%c0_34, %c96], %85 {strides = array<i32>} : memref<8x256xbf16, #tpu.memory_space<vmem>>, vector<8x32xbf16>,
    %87 = vector.extract_strided_slice %8 {offsets = [0, 128], sizes = [8, 32], strides = [1, 1]} : vector<8x256xbf16> to vector<8x32xbf16>
    %88 = vector.extract_strided_slice %11 {offsets = [0, 128], sizes = [8, 32], strides = [1, 1]} : vector<8x256xbf16> to vector<8x32xbf16>
    %89 = vector.extract_strided_slice %14 {offsets = [0, 128], sizes = [8, 32], strides = [1, 1]} : vector<8x256xbf16> to vector<8x32xbf16>
    %cst_35 = arith.constant dense<0.000000e+00> : vector<8x8xf32>
    %90 = tpu.matmul %87, %88, %cst_35 {dimension_numbers = #tpu.dot_dimension_numbers<[1], [1], [0], [0], [0, 0, 1, 0], [], []>} : vector<8x32xbf16>, vector<8x32xbf16>, vector<8x8xf32> -> vector<8x8xf32>
    %cst_36 = arith.constant dense<0xFF800000> : vector<8xf32>
    %91 = vector.multi_reduction <maximumf>, %90, %cst_36 [1] : vector<8x8xf32> to vector<8xf32>
    %92 = vector.shape_cast %91 : vector<8xf32> to vector<8x1xf32>
    %93 = vector.broadcast %92 : vector<8x1xf32> to vector<8x8xf32>
    %94 = arith.subf %90, %93 : vector<8x8xf32>
    %95 = math.exp %94 : vector<8x8xf32>
    %cst_37 = arith.constant dense<0.000000e+00> : vector<8xf32>
    %96 = vector.multi_reduction <add>, %95, %cst_37 [1] : vector<8x8xf32> to vector<8xf32>
    %97 = vector.shape_cast %96 : vector<8xf32> to vector<8x1xf32>
    %98 = arith.truncf %95 : vector<8x8xf32> to vector<8x8xbf16>
    %cst_38 = arith.constant dense<0.000000e+00> : vector<8x32xf32>
    %99 = tpu.matmul %98, %89, %cst_38 {dimension_numbers = #tpu.dot_dimension_numbers<[1], [0], [0], [1], [0, 0, 1, 1], [], []>} : vector<8x8xbf16>, vector<8x32xbf16>, vector<8x32xf32> -> vector<8x32xf32>
    %100 = tpu.reciprocal %97 {approx = true} : vector<8x1xf32> -> vector<8x1xf32>
    %101 = vector.broadcast %100 : vector<8x1xf32> to vector<8x32xf32>
    %102 = arith.mulf %99, %101 : vector<8x32xf32>
    %103 = arith.truncf %102 : vector<8x32xf32> to vector<8x32xbf16>
    %c0_39 = arith.constant 0 : index
    %c128 = arith.constant 128 : index
    %104 = vector.load %arg10[%c0_39, %c128] : memref<8x256xbf16, #tpu.memory_space<vmem>>, vector<8x32xbf16>
    tpu.vector_store %arg10[%c0_39, %c128], %103 {strides = array<i32>} : memref<8x256xbf16, #tpu.memory_space<vmem>>, vector<8x32xbf16>,
    %105 = vector.extract_strided_slice %8 {offsets = [0, 160], sizes = [8, 32], strides = [1, 1]} : vector<8x256xbf16> to vector<8x32xbf16>
    %106 = vector.extract_strided_slice %11 {offsets = [0, 160], sizes = [8, 32], strides = [1, 1]} : vector<8x256xbf16> to vector<8x32xbf16>
    %107 = vector.extract_strided_slice %14 {offsets = [0, 160], sizes = [8, 32], strides = [1, 1]} : vector<8x256xbf16> to vector<8x32xbf16>
    %cst_40 = arith.constant dense<0.000000e+00> : vector<8x8xf32>
    %108 = tpu.matmul %105, %106, %cst_40 {dimension_numbers = #tpu.dot_dimension_numbers<[1], [1], [0], [0], [0, 0, 1, 0], [], []>} : vector<8x32xbf16>, vector<8x32xbf16>, vector<8x8xf32> -> vector<8x8xf32>
    %cst_41 = arith.constant dense<0xFF800000> : vector<8xf32>
    %109 = vector.multi_reduction <maximumf>, %108, %cst_41 [1] : vector<8x8xf32> to vector<8xf32>
    %110 = vector.shape_cast %109 : vector<8xf32> to vector<8x1xf32>
    %111 = vector.broadcast %110 : vector<8x1xf32> to vector<8x8xf32>
    %112 = arith.subf %108, %111 : vector<8x8xf32>
    %113 = math.exp %112 : vector<8x8xf32>
    %cst_42 = arith.constant dense<0.000000e+00> : vector<8xf32>
    %114 = vector.multi_reduction <add>, %113, %cst_42 [1] : vector<8x8xf32> to vector<8xf32>
    %115 = vector.shape_cast %114 : vector<8xf32> to vector<8x1xf32>
    %116 = arith.truncf %113 : vector<8x8xf32> to vector<8x8xbf16>
    %cst_43 = arith.constant dense<0.000000e+00> : vector<8x32xf32>
    %117 = tpu.matmul %116, %107, %cst_43 {dimension_numbers = #tpu.dot_dimension_numbers<[1], [0], [0], [1], [0, 0, 1, 1], [], []>} : vector<8x8xbf16>, vector<8x32xbf16>, vector<8x32xf32> -> vector<8x32xf32>
    %118 = tpu.reciprocal %115 {approx = true} : vector<8x1xf32> -> vector<8x1xf32>
    %119 = vector.broadcast %118 : vector<8x1xf32> to vector<8x32xf32>
    %120 = arith.mulf %117, %119 : vector<8x32xf32>
    %121 = arith.truncf %120 : vector<8x32xf32> to vector<8x32xbf16>
    %c0_44 = arith.constant 0 : index
    %c160 = arith.constant 160 : index
    %122 = vector.load %arg10[%c0_44, %c160] : memref<8x256xbf16, #tpu.memory_space<vmem>>, vector<8x32xbf16>
    tpu.vector_store %arg10[%c0_44, %c160], %121 {strides = array<i32>} : memref<8x256xbf16, #tpu.memory_space<vmem>>, vector<8x32xbf16>,
    %123 = vector.extract_strided_slice %8 {offsets = [0, 192], sizes = [8, 32], strides = [1, 1]} : vector<8x256xbf16> to vector<8x32xbf16>
    %124 = vector.extract_strided_slice %11 {offsets = [0, 192], sizes = [8, 32], strides = [1, 1]} : vector<8x256xbf16> to vector<8x32xbf16>
    %125 = vector.extract_strided_slice %14 {offsets = [0, 192], sizes = [8, 32], strides = [1, 1]} : vector<8x256xbf16> to vector<8x32xbf16>
    %cst_45 = arith.constant dense<0.000000e+00> : vector<8x8xf32>
    %126 = tpu.matmul %123, %124, %cst_45 {dimension_numbers = #tpu.dot_dimension_numbers<[1], [1], [0], [0], [0, 0, 1, 0], [], []>} : vector<8x32xbf16>, vector<8x32xbf16>, vector<8x8xf32> -> vector<8x8xf32>
    %cst_46 = arith.constant dense<0xFF800000> : vector<8xf32>
    %127 = vector.multi_reduction <maximumf>, %126, %cst_46 [1] : vector<8x8xf32> to vector<8xf32>
    %128 = vector.shape_cast %127 : vector<8xf32> to vector<8x1xf32>
    %129 = vector.broadcast %128 : vector<8x1xf32> to vector<8x8xf32>
    %130 = arith.subf %126, %129 : vector<8x8xf32>
    %131 = math.exp %130 : vector<8x8xf32>
    %cst_47 = arith.constant dense<0.000000e+00> : vector<8xf32>
    %132 = vector.multi_reduction <add>, %131, %cst_47 [1] : vector<8x8xf32> to vector<8xf32>
    %133 = vector.shape_cast %132 : vector<8xf32> to vector<8x1xf32>
    %134 = arith.truncf %131 : vector<8x8xf32> to vector<8x8xbf16>
    %cst_48 = arith.constant dense<0.000000e+00> : vector<8x32xf32>
    %135 = tpu.matmul %134, %125, %cst_48 {dimension_numbers = #tpu.dot_dimension_numbers<[1], [0], [0], [1], [0, 0, 1, 1], [], []>} : vector<8x8xbf16>, vector<8x32xbf16>, vector<8x32xf32> -> vector<8x32xf32>
    %136 = tpu.reciprocal %133 {approx = true} : vector<8x1xf32> -> vector<8x1xf32>
    %137 = vector.broadcast %136 : vector<8x1xf32> to vector<8x32xf32>
    %138 = arith.mulf %135, %137 : vector<8x32xf32>
    %139 = arith.truncf %138 : vector<8x32xf32> to vector<8x32xbf16>
    %c0_49 = arith.constant 0 : index
    %c192 = arith.constant 192 : index
    %140 = vector.load %arg10[%c0_49, %c192] : memref<8x256xbf16, #tpu.memory_space<vmem>>, vector<8x32xbf16>
    tpu.vector_store %arg10[%c0_49, %c192], %139 {strides = array<i32>} : memref<8x256xbf16, #tpu.memory_space<vmem>>, vector<8x32xbf16>,
    %141 = vector.extract_strided_slice %8 {offsets = [0, 224], sizes = [8, 32], strides = [1, 1]} : vector<8x256xbf16> to vector<8x32xbf16>
    %142 = vector.extract_strided_slice %11 {offsets = [0, 224], sizes = [8, 32], strides = [1, 1]} : vector<8x256xbf16> to vector<8x32xbf16>
    %143 = vector.extract_strided_slice %14 {offsets = [0, 224], sizes = [8, 32], strides = [1, 1]} : vector<8x256xbf16> to vector<8x32xbf16>
    %cst_50 = arith.constant dense<0.000000e+00> : vector<8x8xf32>
    %144 = tpu.matmul %141, %142, %cst_50 {dimension_numbers = #tpu.dot_dimension_numbers<[1], [1], [0], [0], [0, 0, 1, 0], [], []>} : vector<8x32xbf16>, vector<8x32xbf16>, vector<8x8xf32> -> vector<8x8xf32>
    %cst_51 = arith.constant dense<0xFF800000> : vector<8xf32>
    %145 = vector.multi_reduction <maximumf>, %144, %cst_51 [1] : vector<8x8xf32> to vector<8xf32>
    %146 = vector.shape_cast %145 : vector<8xf32> to vector<8x1xf32>
    %147 = vector.broadcast %146 : vector<8x1xf32> to vector<8x8xf32>
    %148 = arith.subf %144, %147 : vector<8x8xf32>
    %149 = math.exp %148 : vector<8x8xf32>
    %cst_52 = arith.constant dense<0.000000e+00> : vector<8xf32>
    %150 = vector.multi_reduction <add>, %149, %cst_52 [1] : vector<8x8xf32> to vector<8xf32>
    %151 = vector.shape_cast %150 : vector<8xf32> to vector<8x1xf32>
    %152 = arith.truncf %149 : vector<8x8xf32> to vector<8x8xbf16>
    %cst_53 = arith.constant dense<0.000000e+00> : vector<8x32xf32>
    %153 = tpu.matmul %152, %143, %cst_53 {dimension_numbers = #tpu.dot_dimension_numbers<[1], [0], [0], [1], [0, 0, 1, 1], [], []>} : vector<8x8xbf16>, vector<8x32xbf16>, vector<8x32xf32> -> vector<8x32xf32>
    %154 = tpu.reciprocal %151 {approx = true} : vector<8x1xf32> -> vector<8x1xf32>
    %155 = vector.broadcast %154 : vector<8x1xf32> to vector<8x32xf32>
    %156 = arith.mulf %153, %155 : vector<8x32xf32>
    %157 = arith.truncf %156 : vector<8x32xf32> to vector<8x32xbf16>
    %c0_54 = arith.constant 0 : index
    %c224 = arith.constant 224 : index
    %158 = vector.load %arg10[%c0_54, %c224] : memref<8x256xbf16, #tpu.memory_space<vmem>>, vector<8x32xbf16>
    tpu.vector_store %arg10[%c0_54, %c224], %157 {strides = array<i32>} : memref<8x256xbf16, #tpu.memory_space<vmem>>, vector<8x32xbf16>,
    %c0_55 = arith.constant 0 : index
    %c0_56 = arith.constant 0 : index
    %159 = vector.load %arg10[%c0_55, %c0_56] : memref<8x256xbf16, #tpu.memory_space<vmem>>, vector<8x256xbf16>
    %c0_57 = arith.constant 0 : index
    %c0_58 = arith.constant 0 : index
    %160 = vector.load %arg7[%c0_57, %c0_58] : memref<256x32xbf16, #tpu.memory_space<vmem>>, vector<256x32xbf16>
    %cst_59 = arith.constant dense<0.000000e+00> : vector<8x32xf32>
    %161 = tpu.matmul %159, %160, %cst_59 {dimension_numbers = #tpu.dot_dimension_numbers<[1], [0], [0], [1], [0, 0, 1, 1], [], []>} : vector<8x256xbf16>, vector<256x32xbf16>, vector<8x32xf32> -> vector<8x32xf32>
    %c0_60 = arith.constant 0 : index
    %c0_61 = arith.constant 0 : index
    %162 = vector.load %arg8[%c0_60, %c0_61] : memref<1x32xf32, #tpu.memory_space<vmem>>, vector<1x32xf32>
    %163 = vector.broadcast %162 : vector<1x32xf32> to vector<8x32xf32>
    %164 = arith.addf %161, %163 : vector<8x32xf32>
    %c0_62 = arith.constant 0 : index
    %c0_63 = arith.constant 0 : index
    %c0_64 = arith.constant 0 : index
    %165 = vector.load %arg9[%c0_62, %c0_63, %c0_64] : memref<1x8x32xf32, #tpu.memory_space<vmem>>, vector<1x8x32xf32>
    %166 = vector.shape_cast %165 : vector<1x8x32xf32> to vector<8x32xf32>
    %167 = vector.shape_cast %164 : vector<8x32xf32> to vector<1x8x32xf32>
    tpu.vector_store %arg9[%c0_62, %c0_63, %c0_64], %167 {strides = array<i32>} : memref<1x8x32xf32, #tpu.memory_space<vmem>>, vector<1x8x32xf32>,
    return
  }
  func.func @transform_0(%arg0: i32, %arg1: i32) -> (i32, i32, i32) {
    %c0_i32 = arith.constant 0 : i32
    %c0_i32_0 = arith.constant 0 : i32
    return %arg0, %arg1, %c0_i32 : i32, i32, i32
  }
  func.func @transform_1(%arg0: i32, %arg1: i32) -> (i32, i32, i32) {
    %c0_i32 = arith.constant 0 : i32
    %c0_i32_0 = arith.constant 0 : i32
    %c0_i32_1 = arith.constant 0 : i32
    return %arg0, %c0_i32, %c0_i32_0 : i32, i32, i32
  }
  func.func @transform_2(%arg0: i32, %arg1: i32) -> (i32, i32) {
    %c0_i32 = arith.constant 0 : i32
    %c0_i32_0 = arith.constant 0 : i32
    %c0_i32_1 = arith.constant 0 : i32
    return %c0_i32, %c0_i32_0 : i32, i32
  }
  func.func @transform_3(%arg0: i32, %arg1: i32) -> (i32, i32) {
    %c0_i32 = arith.constant 0 : i32
    %c0_i32_0 = arith.constant 0 : i32
    %c0_i32_1 = arith.constant 0 : i32
    return %c0_i32, %c0_i32_0 : i32, i32
  }
  func.func @transform_4(%arg0: i32, %arg1: i32) -> (i32, i32) {
    %c0_i32 = arith.constant 0 : i32
    %c0_i32_0 = arith.constant 0 : i32
    %c0_i32_1 = arith.constant 0 : i32
    return %c0_i32, %c0_i32_0 : i32, i32
  }
  func.func @transform_5(%arg0: i32, %arg1: i32) -> (i32, i32) {
    %c0_i32 = arith.constant 0 : i32
    %c0_i32_0 = arith.constant 0 : i32
    %c0_i32_1 = arith.constant 0 : i32
    return %c0_i32, %c0_i32_0 : i32, i32
  }
  func.func @transform_6(%arg0: i32, %arg1: i32) -> (i32, i32) {
    %c0_i32 = arith.constant 0 : i32
    %c0_i32_0 = arith.constant 0 : i32
    %c0_i32_1 = arith.constant 0 : i32
    return %c0_i32, %c0_i32_0 : i32, i32
  }
  func.func @transform_7(%arg0: i32, %arg1: i32) -> (i32, i32, i32) {
    %c0_i32 = arith.constant 0 : i32
    %c0_i32_0 = arith.constant 0 : i32
    return %arg0, %arg1, %c0_i32 : i32, i32, i32
  }
}

</mosaic_0001>

<bundles_post_ra>
// kernel: tpu_custom_call.1
= control target key start
LH: loop header
LB: loop body
LE: loop exit
PB: predicated region body
PF: predicated region fallthrough
CT: control target
= control target key end

     0   :  { %12 = vsyncpa [#allocation4], 0  ;;  %s2576_s0 = inlined_call_operand.vmem [shape: bf16[2,8,32], index: 0, kind: input, shape index: {}]   ;;  %s2577_s1 = inlined_call_operand.vmem [shape: bf16[2,8,32], index: 1, kind: input, shape index: {}]   ;;  %s2578_s2 = inlined_call_operand.vmem [shape: bf16[32,256], index: 2, kind: input, shape index: {}]   ;;  %s2579_s3 = inlined_call_operand.vmem [shape: bf16[32,256], index: 3, kind: input, shape index: {}]   ;;  %s2580_s4 = inlined_call_operand.vmem [shape: bf16[32,256], index: 4, kind: input, shape index: {}]   ;;  %s2581_s5 = inlined_call_operand.vmem [shape: bf16[256,32], index: 5, kind: input, shape index: {}]   ;;  %s2582_s6 = inlined_call_operand.vmem [shape: f32[1,32], index: 6, kind: input, shape index: {}]   ;;  %s2583_s7 = inlined_call_operand.hbm [shape: f32[2,8,32], index: 7, kind: output, shape index: {}]  }
   0x1   :  { %14 = vsyncpa [#allocation4 + $0x1], 0  ;;  %s2223_s24 = smov 0   ;;  %s2225_s25 = smov 0  }
   0x2   :  { %s2227_s26 = smov 0   ;;  %s2229_s27 = smov 0  }
   0x3   :  { %s2231_s28 = smov 0   ;;  %s2233_s29 = smov 0  }
   0x4 LB: > { %s1743_s30 = sadd.s32 4294967295, %s2174_s29   ;;  %s1744_s8 = sadd.s32 4294967294, %s2174_s29   ;;  %s2174_s29 = sphi %s2233_s29, %s20_s29   ;;  %s2170_s28 = sphi %s2231_s28, %s2590_s28   ;;  %s2166_s27 = sphi %s2229_s27, %s2589_s27   ;;  %s2162_s26 = sphi %s2227_s26, %s2588_s26   ;;  %s2158_s25 = sphi %s2225_s25, %s2587_s25   ;;  %s2154_s24 = sphi %s2223_s24, %s2586_s24  }
   0x5   : > { %s32_s9 = sadd.s32 1, %s2170_s28  ;;  %s200_s10 = sadd.s32 1, %s2162_s26 }
   0x6   : > { %p34_p0 = scmp.ge.s32.totalorder %s32_s9, 2  ;;  %p210_p1 = scmp.ne.s32.totalorder %s2162_s26, %s2158_s25 }
   0x7   : > { %p211_p2 = scmp.eq.s32.totalorder %s1743_s30, 1  ;;  %p216_p3 = scmp.ne.s32.totalorder %s2158_s25, %s2154_s24 }
   0x8   : > { %s2592_s9 = smov (%p34_p0, %s32_s9), 0  ;;  %p217_p5 = scmp.eq.s32.totalorder %s1744_s8, 1 }
   0x9   : > { %p2263_p4 = por %p211_p2, %p210_p1  ;;  %s195_s12 = ssub.s32 %s2170_s28, %s2592_s9 }
   0xa   : > { %p1747_p6 = scmp.ge.s32.totalorder %s2174_s29, 1  ;;  %p198_p7 = scmp.eq.s32.totalorder %s195_s12, 0 }
   0xb   : > { %p2270_p8 = por %p217_p5, %p216_p3  ;;  %p267_p9 = scmp.lt.s32.totalorder %s2174_s29, 3 }
   0xc   : > { %s2276_s14 = scalar_select %p198_p7, %s2162_s26, %s200_s10  }
   0xd   : > { %p268_p10 = pnand %p1747_p6, %p267_p9 }
   0xe   : > { %v2028_v0 = vld [vmem:[%s2578_s2 + $0x4] ss:$8 sps:$4 sm:$0xff] (!%p268_p10)   ;;  %p305_p11 = scmp.lt.s32.totalorder (!%p268_p10), %s2166_s27, 1  ;;  %v2030_v1 = vld [vmem:[%s2578_s2] ss:$8 sps:$4 sm:$0xff] (!%p268_p10)   ;;  %v2176_v2 = vmov (!%p268_p10), 0  }
   0xf   : > { %271 = sbr.rel (%p268_p10) target bundleno = 1398 (0x576), region = 48  ;;  %379 = vmatprep.mubr.bf16.mxu0 (!%p268_p10), %v2176_v2  ;;  %347 = vmatprep.subr.bf16.mxu0 (!%p268_p10), %v2028_v0  ;;  %v2031_v3 = vld [vmem:[%s2578_s2 + $0x14] ss:$8 sps:$4 sm:$0xff] (!%p268_p10)   ;;  %v2033_v4 = vld [vmem:[%s2578_s2 + $0x10] ss:$8 sps:$4 sm:$0xff] (!%p268_p10)   ;;  %vm343_vm0 = vcmask (!%p268_p10), 261120  }
  0x10   : > { %348 = vmatpush1.bf16.msra.mxu0 (!%p268_p10), %v2030_v1  ;;  %v2036_v5 = vld [vmem:[%s2579_s3 + $0x4] ss:$8 sps:$4 sm:$0xff] (!%p268_p10)   ;;  %v2034_v6 = vld [vmem:[%s2579_s3] ss:$8 sps:$4 sm:$0xff] (!%p268_p10)   ;;  %v2039_v8 = vld [vmem:[%s2579_s3 + $0x14] ss:$8 sps:$4 sm:$0xff] (!%p268_p10)  }
  0x11   : > { %349 = vmatprep.subr.bf16.mxu0 (!%p268_p10), %v2031_v3  ;;  %v2037_v9 = vld [vmem:[%s2579_s3 + $0x10] ss:$8 sps:$4 sm:$0xff] (!%p268_p10)   ;;  %v2177_v11 = vmov (!%p268_p10), 0.0   ;;  %vm2178_vm1 = vmmov (!%p268_p10), 0   ;;  %v2040_v21 = vld [vmem:[%s2580_s4] ss:$8 sps:$4 sm:$0xff] (!%p268_p10)  }
  0x12   : > { %1871 = vmatprep.subr.bf16.mxu1 (!%p268_p10), %v2177_v11  ;;  %1873 = vmatprep.mubr.msk.bf16.mxu1 (!%p268_p10), %vm2178_vm1, %v2177_v11  ;;  %v2042_v22 = vld [vmem:[%s2580_s4 + $0x4] ss:$8 sps:$4 sm:$0xff] (!%p268_p10)   ;;  %s2179_s17 = smov (!%p268_p10), 64   ;;  %s2180_s18 = smov (!%p268_p10), 96   ;;  %v2045_v26 = vld [vmem:[%s2580_s4 + $0x14] ss:$8 sps:$4 sm:$0xff] (!%p268_p10)  }
  0x13   : > { %v2043_v27 = vld [vmem:[%s2580_s4 + $0x10] ss:$8 sps:$4 sm:$0xff] (!%p268_p10)   ;;  %s2181_s23 = smov (!%p268_p10), 32   ;;  %vm575_vm2 = vcmask (!%p268_p10), 64512   ;;  %vm589_vm3 = vcmask (!%p268_p10), 1043456   ;;  %vm636_vm4 = vcmask (!%p268_p10), 257024  }
  0x14   : > { %350 = vmatpush1.bf16.msra.mxu0 (!%p268_p10), %v2033_v4  ;;  %vm758_vm5 = vcmask (!%p268_p10), 519424   ;;  %vm877_vm6 = vcmask (!%p268_p10), 781824   ;;  %vm996_vm7 = vcmask (!%p268_p10), 1044224   ;;  %s1808_s12 = sshll.u32 (!%p268_p10), %s2166_s27, 7  ;;  %s2182_s22 = smov (!%p268_p10), [#allocation3]  }
  0x15   : > { %419 = vmatprep.subr.bf16.mxu0 (!%p268_p10), %v2036_v5  ;;  %s2528_s20 = scalar_lea.hbm (!%p268_p10), %s2583_s7, %s1808_s12  ;;  %s2100_s8 = sshll.u32 (!%p268_p10), %s2182_s22, 4  ;;  %s2101_s8 = int_to_ptr.vmem [resolvable:$false] %s2100_s8 }
  0x16   : > { %s306_s21 = scalar_select %p305_p11, %s2166_s27, 1 }
  0x18   : > { %s1749_s30 = sshll.u32 %s306_s21, 2 }
  0x19   : > { %s311_s16 = scalar_lea.vmem %s2576_s0, %s1749_s30  ;;  %s315_s10 = scalar_lea.vmem %s2577_s1, %s1749_s30 }
  0x1a   : > { %v317_v7 = vld [vmem:[%s311_s16] sm:$0xf] }
  0x1b   : > { %1755 = vmatmul.mubr.msk.bf16.vlgmr.msra.gmra.mrb[0].mxu0 %vm343_vm0, %v317_v7  ;;  %v318_v10 = vld [vmem:[%s315_s10] sm:$0xf] }
  0x1c   : > { %420 = vmatpush1.bf16.msra.mxu0 %v2034_v6  ;;  %451 = vmatprep.mubr.bf16.mxu0 %v2176_v2 }
  0x1d   : > { %421 = vmatprep.subr.bf16.mxu0 %v2039_v8 }
  0x20   : > { %422 = vmatpush1.bf16.msra.mxu0 %v2037_v9 }
  0x21   : > { %486 = vmatprep.subr.bf16.mxu0 %v2042_v22 }
  0x23   : > { %1760 = vmatmul.mubr.msk.bf16.vlgmr.msra.gmra.mrb[4].mxu0 %vm343_vm0, %v318_v10 }
  0x24   : > { %518 = vmatprep.mubr.bf16.mxu0 %v2176_v2  ;;  %487 = vmatpush1.bf16.msra.mxu0 %v2040_v21 }
  0x25   : > { %488 = vmatprep.subr.bf16.mxu0 %v2045_v26 }
  0x28   : > { %489 = vmatpush1.bf16.msra.mxu0 %v2043_v27 }
  0x29   : > { %1877 = vmatprep.subr.bf16.mxu0 %v2177_v11 }
  0x2b   : > { %1765 = vmatmul.mubr.msk.bf16.vlgmr.msra.gmra.mrb[8].mxu0 %vm343_vm0, %v318_v10 }
  0x2c   : > { %1879 = vmatprep.mubr.msk.bf16.mxu0 %vm2178_vm1, %v2177_v11 }
  0xee   : > { %v381_v12 = vpop.f32.mrb[0].mxu0 }
  0xef   : > { %v383_v13 = vpop.f32.mrb[1].mxu0  ;;  %v388_v17 = vmul.f32 0.17677669, %v381_v12 }
  0xf0   : > { %v385_v14 = vpop.f32.mrb[2].mxu0  ;;  %v389_v28 = vmul.f32 0.17677669, %v383_v13 }
  0xf1   : > { %v386_v15 = vpop.f32.mrb[3].mxu0  ;;  %v390_v25 = vpack.c.bf16 %v388_v17, %v388_v17 }
  0xf2   : > { %v391_v29 = vpack.c.bf16 %v389_v28, %v389_v28 }
  0xf6   : > { %v453_v16 = vpop.f32.mrb[4].mxu0 }
  0xf7   : > { %v460_v18 = vpack.c.bf16 %v453_v16, %v453_v16  ;;  %v455_v19 = vpop.f32.mrb[5].mxu0 }
  0xf8   : > { %v457_v20 = vpop.f32.mrb[6].mxu0  ;;  %v461_v30 = vpack.c.bf16 %v455_v19, %v455_v19 }
  0xf9   : > { %762 = vrot.lane.b32.xlu1 %v460_v18, %s2179_s17  ;;  %642 = vrot.lane.b32.xlu0 %v460_v18, %s2180_s18  ;;  %v458_v23 = vpop.f32.mrb[7].mxu0  ;;  %v533_v24 = vsel %vm343_vm0, %v460_v18, 0 }
  0xfa   : > { %1872 = vmatpush3.bf16.xpose.msra.mxu1 %v533_v24  ;;  %v1002_v40 = vsel %vm343_vm0, %v461_v30, 0 }
  0xfb   : > { %1883 = vmatprep.subr.bf16.mxu1 %v2177_v11 }
  0xfd   : > { %760 = vrot.lane.b32.xlu1 %v390_v25, %s2179_s17  ;;  %639 = vrot.lane.b32.xlu0 %v390_v25, %s2180_s18 }
  0xfe   : > { %v520_v51 = vpop.f32.mrb[8].mxu0 }
  0xff   : > { %v2381_v54 = vpop.f32.mrb[9].mxu0  ;;  %v527_v56 = vpack.c.bf16 %v520_v51, %v520_v51 }
 0x100   : > { %v524_v57 = vpop.f32.mrb[10].mxu0 }
 0x101   : > { %879 = vrot.lane.b32.xlu1 %v390_v25, %s2181_s23  ;;  %881 = vrot.lane.b32.xlu0 %v460_v18, %s2181_s23  ;;  %v525_v59 = vpop.f32.mrb[11].mxu0  ;;  %v591_v60 = vsel %vm589_vm3, %v527_v56, 0 }
 0x102   : > { %1874 = vmatmul.mubr.msk.bf16.vlgmr.msra.gmra.mrb[0].mxu1 %vm343_vm0, %v390_v25  ;;  %1878 = vmatpush3.bf16.msra.mxu0 %v591_v60 }
 0x103   : > { %1885 = vmatprep.mubr.msk.bf16.mxu1 %vm2178_vm1, %v2177_v11  ;;  %1889 = vmatprep.subr.bf16.mxu0 %v2177_v11 }
 0x105   : > { %1105 = vrot.lane.b32.xlu1 %v391_v29, %s2180_s18  ;;  %1108 = vrot.lane.b32.xlu0 %v461_v30, %s2180_s18 }
 0x109   : > { %1225 = vrot.lane.b32.xlu1 %v391_v29, %s2179_s17  ;;  %1227 = vrot.lane.b32.xlu0 %v461_v30, %s2179_s17 }
 0x10d   : > { %1343 = vrot.lane.b32.xlu1 %v391_v29, %s2181_s23  ;;  %1345 = vrot.lane.b32.xlu0 %v461_v30, %s2181_s23 }
 0x16b   : > { %v643_v31 = vpop.permute.xlu0 %642  ;;  %v763_v33 = vpop.permute.xlu1 %762 }
 0x16c   : > { %v648_v32 = vsel %vm343_vm0, %v643_v31, 0  ;;  %v768_v35 = vsel %vm343_vm0, %v763_v33, 0 }
 0x16d   : > { %1884 = vmatpush3.bf16.xpose.msra.mxu1 %v648_v32 }
 0x16e   : > { %1895 = vmatprep.subr.bf16.mxu1 %v2177_v11 }
 0x16f   : > { %v640_v34 = vpop.permute.xlu0 %639  ;;  %v761_v37 = vpop.permute.xlu1 %760 }
 0x173   : > { %v882_v36 = vpop.permute.xlu0 %881  ;;  %v880_v39 = vpop.permute.xlu1 %879 }
 0x174   : > { %1886 = vmatmul.mubr.msk.bf16.vlgmr.msra.gmra.mrb[4].mxu1 %vm343_vm0, %v640_v34  ;;  %v887_v38 = vsel %vm343_vm0, %v882_v36, 0 }
 0x175   : > { %1896 = vmatpush3.bf16.xpose.msra.mxu1 %v768_v35  ;;  %1897 = vmatprep.mubr.msk.bf16.mxu1 %vm2178_vm1, %v2177_v11 }
 0x176   : > { %1907 = vmatprep.subr.bf16.mxu1 %v2177_v11 }
 0x177   : > { %v1109_v41 = vpop.permute.xlu0 %1108  ;;  %v1106_v44 = vpop.permute.xlu1 %1105 }
 0x178   : > { %v1114_v42 = vsel %vm343_vm0, %v1109_v41, 0 }
 0x17b   : > { %v1228_v43 = vpop.permute.xlu0 %1227  ;;  %v1226_v47 = vpop.permute.xlu1 %1225 }
 0x17c   : > { %1898 = vmatmul.mubr.msk.bf16.vlgmr.msra.gmra.mrb[8].mxu1 %vm343_vm0, %v761_v37  ;;  %v1233_v45 = vsel %vm343_vm0, %v1228_v43, 0 }
 0x17d   : > { %1908 = vmatpush3.bf16.xpose.msra.mxu1 %v887_v38  ;;  %1909 = vmatprep.mubr.msk.bf16.mxu1 %vm2178_vm1, %v2177_v11  ;;  %v528_v38 = vpack.c.bf16 %v2381_v54, %v2381_v54 }
 0x17e   : > { %1919 = vmatprep.subr.bf16.mxu1 %v2177_v11 }
 0x17f   : > { %v1346_v46 = vpop.permute.xlu0 %1345  ;;  %v1344_v49 = vpop.permute.xlu1 %1343 }
 0x180   : > { %v1351_v48 = vsel %vm343_vm0, %v1346_v46, 0 }
 0x184   : > { %1910 = vmatmul.mubr.msk.bf16.vlgmr.msra.gmra.mrb[12].mxu1 %vm343_vm0, %v880_v39 }
 0x185   : > { %1920 = vmatpush3.bf16.xpose.msra.mxu1 %v1002_v40  ;;  %1921 = vmatprep.mubr.msk.bf16.mxu1 %vm2178_vm1, %v2177_v11 }
 0x186   : > { %1931 = vmatprep.subr.bf16.mxu1 %v2177_v11 }
 0x18c   : > { %1922 = vmatmul.mubr.msk.bf16.vlgmr.msra.gmra.mrb[16].mxu1 %vm343_vm0, %v391_v29 }
 0x18d   : > { %1932 = vmatpush3.bf16.xpose.msra.mxu1 %v1114_v42  ;;  %1933 = vmatprep.mubr.msk.bf16.mxu1 %vm2178_vm1, %v2177_v11 }
 0x18e   : > { %1943 = vmatprep.subr.bf16.mxu1 %v2177_v11 }
 0x194   : > { %1934 = vmatmul.mubr.msk.bf16.vlgmr.msra.gmra.mrb[20].mxu1 %vm343_vm0, %v1106_v44 }
 0x195   : > { %1944 = vmatpush3.bf16.xpose.msra.mxu1 %v1233_v45  ;;  %1945 = vmatprep.mubr.msk.bf16.mxu1 %vm2178_vm1, %v2177_v11 }
 0x196   : > { %1955 = vmatprep.subr.bf16.mxu1 %v2177_v11 }
 0x19c   : > { %1946 = vmatmul.mubr.msk.bf16.vlgmr.msra.gmra.mrb[24].mxu1 %vm343_vm0, %v1226_v47 }
 0x19d   : > { %1956 = vmatpush3.bf16.xpose.msra.mxu1 %v1351_v48  ;;  %1957 = vmatprep.mubr.msk.bf16.mxu1 %vm2178_vm1, %v2177_v11 }
 0x1a4   : > { %1958 = vmatmul.mubr.msk.bf16.vlgmr.msra.gmra.mrb[28].mxu1 %vm343_vm0, %v1344_v49 }
 0x1d5   : > { %v569_v50 = vpop.f32.mrb[0].mxu1 }
 0x1d6   : > { %v1875_v52 = vpop.f32.mrb[1].mxu1  ;;  %v576_v53 = vsel %vm575_vm2, %v569_v50, -inf }
 0x1d7   : > { %v572_v55 = vpop.f32.mrb[2].mxu1  ;;  %577 = vmax.xlane.f32.xlu0 %v576_v53 }
 0x1d8   : > { %v1876_v58 = vpop.f32.mrb[3].mxu1 }
 0x247   : > { %v684_v61 = vpop.f32.mrb[4].mxu1 }
 0x248   : > { %v1887_v62 = vpop.f32.mrb[5].mxu1  ;;  %v690_v63 = vsel %vm575_vm2, %v684_v61, -inf }
 0x249   : > { %691 = vmax.xlane.f32.xlu1 %v690_v63  ;;  %v687_v0 = vpop.f32.mrb[6].mxu1  ;;  %v1058_v62 = vsel %vm589_vm3, %v528_v38, 0 }
 0x24a   : > { %v1888_v1 = vpop.f32.mrb[7].mxu1 }
 0x24f   : > { %v804_v2 = vpop.f32.mrb[8].mxu1 }
 0x250   : > { %v1899_v3 = vpop.f32.mrb[9].mxu1  ;;  %v810_v4 = vsel %vm575_vm2, %v804_v2, -inf }
 0x251   : > { %v807_v5 = vpop.f32.mrb[10].mxu1  ;;  %811 = vmax.xlane.f32.xlu0 %v810_v4 }
 0x252   : > { %v1900_v6 = vpop.f32.mrb[11].mxu1 }
 0x257   : > { %v923_v7 = vpop.f32.mrb[12].mxu1 }
 0x258   : > { %v1911_v8 = vpop.f32.mrb[13].mxu1  ;;  %v929_v9 = vsel %vm575_vm2, %v923_v7, -inf }
 0x259   : > { %v926_v10 = vpop.f32.mrb[14].mxu1  ;;  %930 = vmax.xlane.f32.xlu0 %v929_v9 }
 0x25a   : > { %v1912_v12 = vpop.f32.mrb[15].mxu1  ;;  %820 = vrot.lane.b32.xlu1 %v527_v56, %s2179_s17 }
 0x25e   : > { %939 = vrot.lane.b32.xlu1 %v527_v56, %s2181_s23 }
 0x25f   : > { %v2390_v13 = vpop.f32.mrb[16].mxu1 }
 0x260   : > { %v1923_v14 = vpop.f32.mrb[17].mxu1  ;;  %v1044_v34 = vsel %vm575_vm2, %v2390_v13, -inf }
 0x261   : > { %v1041_v15 = vpop.f32.mrb[18].mxu1 }
 0x262   : > { %v1924_v16 = vpop.f32.mrb[19].mxu1 }
 0x264   : > { %v578_v17 = vpop.xlane.xlu0 %577 }
 0x265   : > { %v579_v18 = vsub.f32 %v569_v50, %v578_v17 }
 0x267   : > { %v580_v19 = vmul.f32 1.442695, %v579_v18  ;;  %v2392_v20 = vpop.f32.mrb[20].mxu1 }
 0x268   : > { %v1935_v21 = vpop.f32.mrb[21].mxu1  ;;  %v1156_v35 = vsel %vm575_vm2, %v2392_v20, -inf }
 0x269   : > { %2064 = vpow2.f32 %v580_v19  ;;  %v1153_v22 = vpop.f32.mrb[22].mxu1 }
 0x26a   : > { %v1936_v23 = vpop.f32.mrb[23].mxu1 }
 0x26f   : > { %v2394_v24 = vpop.f32.mrb[24].mxu1  ;;  %701 = vrot.lane.b32.xlu0 %v527_v56, %s2180_s18 }
 0x270   : > { %v1947_v25 = vpop.f32.mrb[25].mxu1  ;;  %v1275_v37 = vsel %vm575_vm2, %v2394_v24, -inf }
 0x271   : > { %v1272_v26 = vpop.f32.mrb[26].mxu1 }
 0x272   : > { %v1948_v27 = vpop.f32.mrb[27].mxu1 }
 0x273   : > { %v2397_v28 = vpop.eup %2064 }
 0x274   : > { %v585_v29 = vpack.c.bf16 %v2397_v28, %v2397_v28  ;;  %v582_v23 = vsel %vm575_vm2, %v2397_v28, 0.0 }
 0x276   : > { %1880 = vmatmul.mubr.msk.bf16.vlgmr.msra.gmra.mrb[12].mxu0 %vm575_vm2, %v585_v29 }
 0x277   : > { %v2402_v30 = vpop.f32.mrb[28].mxu1  ;;  %1891 = vmatprep.mubr.msk.bf16.mxu0 %vm2178_vm1, %v2177_v11 }
 0x278   : > { %v1959_v31 = vpop.f32.mrb[29].mxu1  ;;  %v1393_v36 = vsel %vm575_vm2, %v2402_v30, -inf }
 0x279   : > { %v1390_v32 = vpop.f32.mrb[30].mxu1 }
 0x27a   : > { %v1960_v33 = vpop.f32.mrb[31].mxu1 }
 0x282   : > { %1045 = vmax.xlane.f32.xlu1 %v1044_v34 }
 0x286   : > { %1157 = vmax.xlane.f32.xlu1 %v1156_v35 }
 0x28a   : > { %1394 = vmax.xlane.f32.xlu1 %v1393_v36 }
 0x28e   : > { %1276 = vmax.xlane.f32.xlu0 %v1275_v37 }
 0x29b   : > { %1285 = vrot.lane.b32.xlu1 %v528_v38, %s2179_s17 }
 0x2a4   : > { %1167 = vrot.lane.b32.xlu0 %v528_v38, %s2180_s18 }
 0x2a8   : > { %1403 = vrot.lane.b32.xlu0 %v528_v38, %s2181_s23 }
 0x2d6   : > { %v692_v39 = vpop.xlane.xlu1 %691 }
 0x2d7   : > { %v693_v40 = vsub.f32 %v684_v61, %v692_v39 }
 0x2d9   : > { %v694_v41 = vmul.f32 1.442695, %v693_v40 }
 0x2da   : > { %v821_v51 = vpop.permute.xlu1 %820 }
 0x2db   : > { %2066 = vpow2.f32 %v694_v41  ;;  %v826_v56 = vsel %vm589_vm3, %v821_v51, 0 }
 0x2de   : > { %v812_v42 = vpop.xlane.xlu0 %811  ;;  %v940_v57 = vpop.permute.xlu1 %939 }
 0x2df   : > { %v813_v43 = vsub.f32 %v804_v2, %v812_v42  ;;  %v945_v59 = vsel %vm589_vm3, %v940_v57, 0  ;;  %v2046_v42 = vld [vmem:[%s2581_s5 + $0x40] sm:$0xff]  }
 0x2e0   : > { %1849 = vmatprep.subr.bf16.mxu1 %v2046_v42 }
 0x2e1   : > { %v814_v44 = vmul.f32 1.442695, %v813_v43  ;;  %v2047_v43 = vld [vmem:[%s2581_s5] sm:$0xff]  }
 0x2e2   : > { %1850 = vmatpush3.bf16.msra.mxu1 %v2047_v43 }
 0x2e3   : > { %2068 = vpow2.f32 %v814_v44  ;;  %v2048_v44 = vld [vmem:[%s2581_s5 + $0x48] sm:$0xff]  }
 0x2e4   : > { %1851 = vmatprep.subr.bf16.mxu1 %v2048_v44 }
 0x2e5   : > { %v2067_v45 = vpop.eup %2066 }
 0x2e6   : > { %v931_v46 = vpop.xlane.xlu0 %930  ;;  %v696_v47 = vsel %vm575_vm2, %v2067_v45, 0.0  ;;  %v699_v54 = vpack.c.bf16 %v2067_v45, %v2067_v45 }
 0x2e7   : > { %697 = vadd.xlane.f32.xlu0 %v696_v47  ;;  %v932_v48 = vsub.f32 %v923_v7, %v931_v46 }
 0x2e9   : > { %v933_v52 = vmul.f32 1.442695, %v932_v48 }
 0x2ea   : > { %v702_v49 = vpop.permute.xlu0 %701 }
 0x2eb   : > { %v707_v50 = vsel %vm589_vm3, %v702_v49, 0  ;;  %2070 = vpow2.f32 %v933_v52 }
 0x2ec   : > { %1890 = vmatpush3.bf16.msra.mxu0 %v707_v50 }
 0x2ed   : > { %v2069_v53 = vpop.eup %2068  ;;  %1901 = vmatprep.subr.bf16.mxu0 %v2177_v11 }
 0x2ee   : > { %v816_v55 = vsel %vm575_vm2, %v2069_v53, 0.0  ;;  %v819_v58 = vpack.c.bf16 %v2069_v53, %v2069_v53 }
 0x2ef   : > { %1892 = vmatmul.mubr.msk.bf16.vlgmr.msra.gmra.mrb[16].mxu0 %vm575_vm2, %v699_v54  ;;  %817 = vadd.xlane.f32.xlu0 %v816_v55 }
 0x2f0   : > { %1902 = vmatpush3.bf16.msra.mxu0 %v826_v56  ;;  %1903 = vmatprep.mubr.msk.bf16.mxu0 %vm2178_vm1, %v2177_v11 }
 0x2f1   : > { %1913 = vmatprep.subr.bf16.mxu0 %v2177_v11 }
 0x2f5   : > { %v2071_v60 = vpop.eup %2070 }
 0x2f6   : > { %v938_v61 = vpack.c.bf16 %v2071_v60, %v2071_v60  ;;  %v935_v19 = vsel %vm575_vm2, %v2071_v60, 0.0 }
 0x2f7   : > { %1904 = vmatmul.mubr.msk.bf16.vlgmr.msra.gmra.mrb[20].mxu0 %vm575_vm2, %v819_v58 }
 0x2f8   : > { %1914 = vmatpush3.bf16.msra.mxu0 %v945_v59  ;;  %1915 = vmatprep.mubr.msk.bf16.mxu0 %vm2178_vm1, %v2177_v11 }
 0x2f9   : > { %1925 = vmatprep.subr.bf16.mxu0 %v2177_v11 }
 0x2ff   : > { %1916 = vmatmul.mubr.msk.bf16.vlgmr.msra.gmra.mrb[24].mxu0 %vm575_vm2, %v938_v61 }
 0x300   : > { %1926 = vmatpush3.bf16.msra.mxu0 %v1058_v62  ;;  %1927 = vmatprep.mubr.msk.bf16.mxu0 %vm2178_vm1, %v2177_v11 }
 0x301   : > { %1937 = vmatprep.subr.bf16.mxu0 %v2177_v11 }
 0x30f   : > { %v1046_v63 = vpop.xlane.xlu1 %1045 }
 0x310   : > { %v1047_v0 = vsub.f32 %v2390_v13, %v1046_v63 }
 0x312   : > { %v1048_v1 = vmul.f32 1.442695, %v1047_v0 }
 0x313   : > { %v1158_v2 = vpop.xlane.xlu1 %1157 }
 0x314   : > { %2072 = vpow2.f32 %v1048_v1  ;;  %v1159_v3 = vsub.f32 %v2392_v20, %v1158_v2 }
 0x316   : > { %v1160_v4 = vmul.f32 1.442695, %v1159_v3 }
 0x317   : > { %v1395_v5 = vpop.xlane.xlu1 %1394 }
 0x318   : > { %2074 = vpow2.f32 %v1160_v4  ;;  %v1396_v6 = vsub.f32 %v2402_v30, %v1395_v5  ;;  %v2049_v5 = vld [vmem:[%s2581_s5 + $0x8] sm:$0xff]  }
 0x319   : > { %1852 = vmatpush3.bf16.msra.mxu1 %v2049_v5 }
 0x31a   : > { %v1397_v10 = vmul.f32 1.442695, %v1396_v6 }
 0x31b   : > { %v1277_v7 = vpop.xlane.xlu0 %1276  ;;  %v1286_v18 = vpop.permute.xlu1 %1285 }
 0x31c   : > { %v1278_v8 = vsub.f32 %v2394_v24, %v1277_v7  ;;  %v1291_v21 = vsel %vm589_vm3, %v1286_v18, 0 }
 0x31e   : > { %v2073_v9 = vpop.eup %2072  ;;  %v1279_v12 = vmul.f32 1.442695, %v1278_v8  ;;  %v2050_v8 = vld [vmem:[%s2581_s5 + $0x50] sm:$0xff]  }
 0x31f   : > { %v1168_v14 = vpop.permute.xlu0 %1167  ;;  %v1053_v15 = vpack.c.bf16 %v2073_v9, %v2073_v9  ;;  %v1050_v28 = vsel %vm575_vm2, %v2073_v9, 0.0  ;;  %1853 = vmatprep.subr.bf16.mxu1 %v2050_v8 }
 0x320   : > { %2076 = vpow2.f32 %v1279_v12  ;;  %v1173_v13 = vsel %vm589_vm3, %v1168_v14, 0 }
 0x321   : > { %1928 = vmatmul.mubr.msk.bf16.vlgmr.msra.gmra.mrb[28].mxu0 %vm575_vm2, %v1053_v15  ;;  %2078 = vpow2.f32 %v1397_v10 }
 0x322   : > { %v2075_v16 = vpop.eup %2074  ;;  %1938 = vmatpush3.bf16.msra.mxu0 %v1173_v13  ;;  %1939 = vmatprep.mubr.msk.bf16.mxu0 %vm2178_vm1, %v2177_v11  ;;  %v2051_v13 = vld [vmem:[%s2581_s5 + $0x10] sm:$0xff]  }
 0x323   : > { %v1162_v17 = vsel %vm575_vm2, %v2075_v16, 0.0  ;;  %1949 = vmatprep.subr.bf16.mxu0 %v2177_v11  ;;  %v1165_v20 = vpack.c.bf16 %v2075_v16, %v2075_v16  ;;  %v1404_v26 = vpop.permute.xlu0 %1403  ;;  %v2052_v16 = vld [vmem:[%s2581_s5 + $0x58] sm:$0xff]   ;;  %1854 = vmatpush3.bf16.msra.mxu1 %v2051_v13 }
 0x324   : > { %1163 = vadd.xlane.f32.xlu1 %v1162_v17  ;;  %v1409_v30 = vsel %vm589_vm3, %v1404_v26, 0  ;;  %1855 = vmatprep.subr.bf16.mxu1 %v2052_v16  ;;  %v2053_v17 = vld [vmem:[%s2581_s5 + $0x18] sm:$0xff]  }
 0x327   : > { %1856 = vmatpush3.bf16.msra.mxu1 %v2053_v17 }
 0x328   : > { %936 = vadd.xlane.f32.xlu1 %v935_v19 }
 0x329   : > { %1940 = vmatmul.mubr.msk.bf16.vlgmr.msra.gmra.mrb[32].mxu0 %vm575_vm2, %v1165_v20  ;;  %v2054_v20 = vld [vmem:[%s2581_s5 + $0x60] sm:$0xff]  }
 0x32a   : > { %v2077_v22 = vpop.eup %2076  ;;  %1950 = vmatpush3.bf16.msra.mxu0 %v1291_v21  ;;  %1951 = vmatprep.mubr.msk.bf16.mxu0 %vm2178_vm1, %v2177_v11 }
 0x32b   : > { %v1281_v24 = vsel %vm575_vm2, %v2077_v22, 0.0  ;;  %1961 = vmatprep.subr.bf16.mxu0 %v2177_v11  ;;  %v2079_v25 = vpop.eup %2078  ;;  %v1284_v29 = vpack.c.bf16 %v2077_v22, %v2077_v22  ;;  %1857 = vmatprep.subr.bf16.mxu1 %v2054_v20 }
 0x32c   : > { %583 = vadd.xlane.f32.xlu1 %v582_v23  ;;  %1282 = vadd.xlane.f32.xlu0 %v1281_v24  ;;  %v1399_v27 = vsel %vm575_vm2, %v2079_v25, 0.0  ;;  %v1402_v31 = vpack.c.bf16 %v2079_v25, %v2079_v25  ;;  %v2055_v23 = vld [vmem:[%s2581_s5 + $0x20] sm:$0xff]   ;;  %v2056_v25 = vld [vmem:[%s2581_s5 + $0x68] sm:$0xff]  }
 0x32d   : > { %1858 = vmatpush3.bf16.msra.mxu1 %v2055_v23 }
 0x32e   : > { %1859 = vmatprep.subr.bf16.mxu1 %v2056_v25 }
 0x330   : > { %1400 = vadd.xlane.f32.xlu0 %v1399_v27 }
 0x331   : > { %1952 = vmatmul.mubr.msk.bf16.vlgmr.msra.gmra.mrb[36].mxu0 %vm575_vm2, %v1284_v29 }
 0x332   : > { %1962 = vmatpush3.bf16.msra.mxu0 %v1409_v30  ;;  %1963 = vmatprep.mubr.msk.bf16.mxu0 %vm2178_vm1, %v2177_v11  ;;  %v2057_v30 = vld [vmem:[%s2581_s5 + $0x28] sm:$0xff]  }
 0x333   : > { %1860 = vmatpush3.bf16.msra.mxu1 %v2057_v30 }
 0x334   : > { %1051 = vadd.xlane.f32.xlu0 %v1050_v28 }
 0x339   : > { %1964 = vmatmul.mubr.msk.bf16.vlgmr.msra.gmra.mrb[40].mxu0 %vm575_vm2, %v1402_v31 }
 0x349   : > { %v627_v32 = vpop.f32.mrb[12].mxu0 }
 0x34a   : > { %v1881_v33 = vpop.f32.mrb[13].mxu0 }
 0x34b   : > { %v630_v34 = vpop.f32.mrb[14].mxu0 }
 0x34c   : > { %v1882_v35 = vpop.f32.mrb[15].mxu0 }
 0x34d   : > { %v2059_v35 = vld [vmem:[%s2581_s5 + $0x30] sm:$0xff]  }
 0x374   : > { %v698_v37 = vpop.xlane.xlu0 %697 }
 0x375   : > { %2080 = vrcp.f32 %v698_v37  ;;  %v2060_v37 = vld [vmem:[%s2581_s5 + $0x78] sm:$0xff]  }
 0x37c   : > { %v818_v40 = vpop.xlane.xlu0 %817 }
 0x37f   : > { %v2081_v41 = vpop.eup %2080 }
 0x3b1   : > { %v1164_v36 = vpop.xlane.xlu1 %1163 }
 0x3b5   : > { %v937_v38 = vpop.xlane.xlu1 %936 }
 0x3b9   : > { %v584_v39 = vpop.xlane.xlu1 %583  ;;  %v1283_v2 = vpop.xlane.xlu0 %1282 }
 0x3ba   : > { %2082 = vrcp.f32 %v584_v39 }
 0x3bb   : > { %2084 = vrcp.f32 %v818_v40  ;;  %v2061_v40 = vld [vmem:[%s2581_s5 + $0x38] sm:$0xff]  }
 0x3bc   : > { %2086 = vrcp.f32 %v937_v38 }
 0x3bd   : > { %v1401_v3 = vpop.xlane.xlu0 %1400 }
 0x3c1   : > { %v1052_v4 = vpop.xlane.xlu0 %1051 }
 0x3c2   : > { %v743_v11 = vpop.f32.mrb[16].mxu0  ;;  %2088 = vrcp.f32 %v1052_v4 }
 0x3c3   : > { %v750_v45 = vmul.f32 %v2081_v41, %v743_v11  ;;  %v1893_v46 = vpop.f32.mrb[17].mxu0  ;;  %2090 = vrcp.f32 %v1164_v36 }
 0x3c4   : > { %v2083_v47 = vpop.eup %2082  ;;  %v746_v48 = vpop.f32.mrb[18].mxu0  ;;  %2092 = vrcp.f32 %v1283_v2 }
 0x3c5   : > { %v1811_v49 = vpack.c.bf16 %v750_v45, %v750_v45  ;;  %v1894_v50 = vpop.f32.mrb[19].mxu0  ;;  %v634_v51 = vmul.f32 %v2083_v47, %v627_v32  ;;  %v2085_v53 = vpop.eup %2084  ;;  %2094 = vrcp.f32 %v1401_v3  ;;  %v2058_v32 = vld [vmem:[%s2581_s5 + $0x70] sm:$0xff]  }
 0x3c6   : > { %v2087_v60 = vpop.eup %2086  ;;  %1861 = vmatprep.subr.bf16.mxu1 %v2058_v32 }
 0x3c7   : > { %755 = vrot.lane.b32.xlu1 %v1811_v49, %s2181_s23  ;;  %v635_v52 = vpack.c.bf16 %v634_v51, %v634_v51  ;;  %1862 = vmatpush3.bf16.msra.mxu1 %v2059_v35 }
 0x3c8   : > { %1863 = vmatprep.subr.bf16.mxu1 %v2060_v37 }
 0x3c9   : > { %637 = vst.msk [vmem:[#allocation2] sm:$0xf] %vm636_vm4, %v635_v52 }
 0x3ca   : > { %v862_v54 = vpop.f32.mrb[20].mxu0 }
 0x3cb   : > { %v869_v55 = vmul.f32 %v2085_v53, %v862_v54  ;;  %v1905_v56 = vpop.f32.mrb[21].mxu0  ;;  %1864 = vmatpush3.bf16.msra.mxu1 %v2061_v40 }
 0x3cc   : > { %v865_v57 = vpop.f32.mrb[22].mxu0  ;;  %v2089_v6 = vpop.eup %2088 }
 0x3cd   : > { %v1812_v58 = vpack.c.bf16 %v869_v55, %v869_v55  ;;  %v1906_v59 = vpop.f32.mrb[23].mxu0  ;;  %v2091_v18 = vpop.eup %2090  ;;  %v1788_v57 = vld [vmem:[%s2582_s6] ss:$0 sm:$0xff] }
 0x3ce   : > { %v2093_v28 = vpop.eup %2092 }
 0x3cf   : > { %874 = vrot.lane.b32.xlu1 %v1812_v58, %s2179_s17  ;;  %v2095_v41 = vpop.eup %2094 }
 0x3d2   : > { %v981_v61 = vpop.f32.mrb[24].mxu0 }
 0x3d3   : > { %v988_v62 = vmul.f32 %v2087_v60, %v981_v61  ;;  %v1917_v63 = vpop.f32.mrb[25].mxu0 }
 0x3d4   : > { %v984_v0 = vpop.f32.mrb[26].mxu0 }
 0x3d5   : > { %v1918_v1 = vpop.f32.mrb[27].mxu0  ;;  %v1813_v29 = vpack.c.bf16 %v988_v62, %v988_v62 }
 0x3f4   : > { %v1094_v7 = vpop.f32.mrb[28].mxu0 }
 0x3f5   : > { %v1101_v9 = vmul.f32 %v2089_v6, %v1094_v7  ;;  %v1929_v10 = vpop.f32.mrb[29].mxu0 }
 0x3f6   : > { %v1097_v12 = vpop.f32.mrb[30].mxu0 }
 0x3f7   : > { %v1102_v14 = vpack.c.bf16 %v1101_v9, %v1101_v9  ;;  %v1930_v15 = vpop.f32.mrb[31].mxu0 }
 0x3f9   : > { %1103 = vst.msk [vmem:[#allocation2 + $0x4] sm:$0xf] %vm636_vm4, %v1102_v14 }
 0x3fc   : > { %v1209_v19 = vpop.f32.mrb[32].mxu0 }
 0x3fd   : > { %v1216_v21 = vmul.f32 %v2091_v18, %v1209_v19  ;;  %v1941_v22 = vpop.f32.mrb[33].mxu0 }
 0x3fe   : > { %v1212_v24 = vpop.f32.mrb[34].mxu0 }
 0x3ff   : > { %v1814_v26 = vpack.c.bf16 %v1216_v21, %v1216_v21  ;;  %v1942_v27 = vpop.f32.mrb[35].mxu0 }
 0x401   : > { %1221 = vrot.lane.b32.xlu0 %v1814_v26, %s2181_s23 }
 0x404   : > { %v1327_v31 = vpop.f32.mrb[36].mxu0 }
 0x405   : > { %v1334_v33 = vmul.f32 %v2093_v28, %v1327_v31  ;;  %993 = vrot.lane.b32.xlu0 %v1813_v29, %s2180_s18  ;;  %v1953_v34 = vpop.f32.mrb[37].mxu0 }
 0x406   : > { %v1330_v36 = vpop.f32.mrb[38].mxu0 }
 0x407   : > { %v1815_v38 = vpack.c.bf16 %v1334_v33, %v1334_v33  ;;  %v1954_v39 = vpop.f32.mrb[39].mxu0 }
 0x409   : > { %1339 = vrot.lane.b32.xlu1 %v1815_v38, %s2179_s17  ;;  %s302_s17 = sand.u32 1, %s2158_s25  }
 0x40a   : > { %s1646_s21 = scalar_lea.sflag [#allocation4], %s302_s17 }
 0x40c   : > { %v1445_v11 = vpop.f32.mrb[40].mxu0 }
 0x40d   : > { %v1452_v42 = vmul.f32 %v2095_v41, %v1445_v11  ;;  %v1965_v43 = vpop.f32.mrb[41].mxu0 }
 0x40e   : > { %v1448_v44 = vpop.f32.mrb[42].mxu0 }
 0x40f   : > { %v1816_v45 = vpack.c.bf16 %v1452_v42, %v1452_v42  ;;  %v1966_v46 = vpop.f32.mrb[43].mxu0 }
 0x411   : > { %1457 = vrot.lane.b32.xlu1 %v1816_v45, %s2180_s18  ;;  %s1748_s18 = sshll.u32 %s302_s17, 3 }
 0x412   : > { %s304_s15 = scalar_lea.vmem [#allocation3], %s1748_s18  ;;  %s2102_s18 = scalar_lea.vmem %s2101_s8, 256 }
 0x413   : > { %s1660_s16 = sshll.u32 %s304_s15, 4  ;;  %s2530_s16 = int_to_ptr.vmem [resolvable:$true] %s1660_s16 }
 0x414   : > { %s2096_s27 = scalar_lea.vmem %s2530_s16, 128  ;;  %p2103_p1 = scmp.lt.s32.totalorder %s2530_s16, %s2101_s8 }
 0x415   : > { %p2097_p12 = scmp.ne.s32.totalorder %s2530_s16, %s2096_s27  ;;  %p2104_p2 = scmp.lt.s32.totalorder %s2102_s18, %s2096_s27 }
 0x417   : > { %p2098_p13 = pnand %p2097_p12, %p2263_p4  ;;  %p2105_p3 = por %p2104_p2, %p2103_p1 }
 0x419   : > { %p2099_p0 = pneg %p2098_p13 }
 0x41b   : > { %p2106_p5 = pnand %p2105_p3, %p2099_p0 }
 0x439   : > { %v756_v47 = vpop.permute.xlu1 %755 }
 0x43a   : > { %759 = vst.msk [vmem:[#allocation2] sm:$0xf] %vm758_vm5, %v756_v47 }
 0x441   : > { %v875_v48 = vpop.permute.xlu1 %874 }
 0x442   : > { %878 = vst.msk [vmem:[#allocation2] sm:$0xf] %vm877_vm6, %v875_v48 }
 0x473   : > { %v1222_v49 = vpop.permute.xlu0 %1221 }
 0x474   : > { %1224 = vst.msk [vmem:[#allocation2 + $0x4] sm:$0xf] %vm758_vm5, %v1222_v49 }
 0x477   : > { %v994_v50 = vpop.permute.xlu0 %993 }
 0x478   : > { %997 = vst.msk [vmem:[#allocation2] sm:$0xf] %vm996_vm7, %v994_v50 }
 0x47b   : > { %v1340_v51 = vpop.permute.xlu1 %1339 }
 0x47c   : > { %1342 = vst.msk [vmem:[#allocation2 + $0x4] sm:$0xf] %vm877_vm6, %v1340_v51 }
 0x483   : > { %v1458_v52 = vpop.permute.xlu1 %1457 }
 0x484   : > { %1460 = vst.msk [vmem:[#allocation2 + $0x4] sm:$0xf] %vm996_vm7, %v1458_v52 }
 0x48b   : > { %v1461_v53 = vld [vmem:[#allocation2] sm:$0xff] }
 0x48c   : > { %v1789_v54 = vcombine.low %v1461_v53, %v1461_v53  ;;  %v1790_v55 = vcombine.high %v1461_v53, %v1461_v53 }
 0x48e   : > { %1636 = vmatprep.mubr.bf16.mxu1 %v1790_v55 }
 0x48f   : > { %1637 = vmatmul.mubr.bf16.vlgmr.msra.gmra.mrb[32].mxu1 %v1789_v54 }
 0x562   : > { %v1865_v56 = vpop.f32.mrb[32].mxu1 }
 0x563   : > { %v1866_v58 = vpop.f32.mrb[33].mxu1 }
 0x564   : > { %v1867_v59 = vadd.f32 %v1866_v58, %v1865_v56  ;;  %v1868_v60 = vpop.f32.mrb[34].mxu1 }
 0x565   : > { %v1869_v61 = vpop.f32.mrb[35].mxu1 }
 0x566   : > { %v1639_v62 = vadd.f32 %v1867_v59, %v1788_v57 }
 0x568   : > { %1644 = vst.msk [vmem:[%s304_s15] sm:$0xff] %vm343_vm0, %v1639_v62 }
 0x569   : > { %2109 = shalt.err (!%p2106_p5)
}
 0x56a   : > { %s2110_s17 = scalar_lea.hbm %s2528_s20, 128  ;;  %s2114_s12 = scalar_lea.hbm %s2583_s7, 256 }
 0x56b   : > { %p2111_p6 = scmp.ne.s32.totalorder %s2528_s20, %s2110_s17  ;;  %p2115_p10 = scmp.lt.u32.totalorder %s2528_s20, %s2583_s7 }
 0x56c   : > { %p2116_p11 = scmp.lt.u32.totalorder %s2114_s12, %s2110_s17  ;;  %p2118_p13 = scmp.lt.u32.totalorder %s2110_s17, %s2528_s20 }
 0x56d   : > { %p2112_p7 = pnand %p2111_p6, %p2263_p4 }
 0x56e   : > { %p2117_p12 = por %p2116_p11, %p2115_p10 }
 0x56f   : > { %p2113_p9 = pneg %p2112_p7 }
 0x570   : > { %p2119_p0 = por %p2118_p13, %p2117_p12 }
 0x572   : > { %p2120_p1 = pnand %p2119_p0, %p2113_p9 }
 0x574   : > { %2123 = shalt.err (!%p2120_p1)
}
 0x575   : > { %1967 = dma.vmem_to_hbm [thread:$0]  (%p2263_p4), %s2530_s16, 128, %s2528_s20, %s1646_s21  }
 0x576 PF: > { %p1973_p2 = scmp.ge.s32.totalorder %s2174_s29, 2  ;;  %s1672_s19 = sand.u32 1, %s2154_s24  }
 0x577   : > { %s1673_s27 = scalar_lea.sflag [#allocation4], %s1672_s19 }
 0x578   : > { %p1970_p3 = pnand %p1973_p2, %p2270_p8 }
 0x57a   : > { %2149 = dma.done.wait (!%p1970_p3), %s1673_s27, 128  }
 0x57b   : > { %2151 = vsyncadd (!%p1970_p3), %s1673_s27, 4294967168  ;;  %s20_s29 = sadd.s32 1, %s2174_s29   ;;  %s2586_s24 = smov %s2158_s25 }
 0x57c   : > { %p17_p5 = scmp.ge.s32.totalorder %s20_s29, 4   ;;  %s2587_s25 = smov %s2162_s26 }
 0x57d   : > { %s2588_s26 = smov %s2276_s14  ;;  %s2589_s27 = smov %s2170_s28 }
 0x57e   : > { %s2590_s28 = smov %s2592_s9  ;;  %19 = sbr.rel (!%p17_p5) target bundleno = 4 (0x4), region = 86 }
 0x585   :  { %1678 = vsyncpa [#allocation4], 1 }
 0x586   :  { %1680 = vsyncpa [#allocation4 + $0x1], 1 }

</bundles_post_ra>
